<compile_context>
chip_gen: v6e
topology: v6e:2x2x1
jax: 0.10.0
libtpu: 0.0.40
codegen_flags: <defaults>
</compile_context>

<pallas_src>
import functools

import jax
import jax.numpy as jnp
from jax import lax
from jax.experimental import pallas as pl
from jax.experimental.pallas import tpu as pltpu

_EPS = 1e-5


# ------------------------------ Pallas kernel ------------------------------- #

def _conv3x3(get_tap, w_ref, rows, cols, cin, accumulate):
    """3x3 conv as MXU matmul(s); get_tap(kh, kw) -> (rows, cols, cin) bf16.

    accumulate=False: single K-folded matmul, K = 9*cin (small channels / v5e).
    accumulate=True : 9 accumulated matmuls, K = cin (avoids the large lane
                      concatenate when cin >= 128).
    Returns (rows*cols, cout) float32.
    """
    if accumulate:
        acc = None
        t = 0
        for kh in range(3):
            for kw in range(3):
                lhs = get_tap(kh, kw).reshape(rows * cols, cin)
                rhs = w_ref[t * cin:(t + 1) * cin, :]
                part = jnp.dot(lhs, rhs, preferred_element_type=jnp.float32)
                acc = part if acc is None else acc + part
                t += 1
        return acc
    taps = [get_tap(kh, kw) for kh in range(3) for kw in range(3)]
    lhs = jnp.concatenate(taps, axis=-1).reshape(rows * cols, 9 * cin)
    return jnp.dot(lhs, w_ref[...], preferred_element_type=jnp.float32)


def _basic_block_kernel(stride, proj, acc1, acc2, ho, *refs):
    """Fused BasicBlock forward for one (batch, row-tile) grid point."""
    if stride == 1:
        if proj:
            (x_ref, w1_ref, s1_ref, b1_ref, w2_ref, s2_ref, b2_ref,
             wsc_ref, ssc_ref, bsc_ref, o_ref) = refs
        else:
            (x_ref, w1_ref, s1_ref, b1_ref, w2_ref, s2_ref, b2_ref,
             o_ref) = refs
    else:
        (t_ref, w1_ref, s1_ref, b1_ref, w2_ref, s2_ref, b2_ref,
         wsc_ref, ssc_ref, bsc_ref, o_ref) = refs

    _, trh, wo, cout = o_ref.shape
    t1 = trh + 2                      # conv1 rows incl. +/-1 row halo for conv2
    r0 = pl.program_id(1) * trh       # first output row of this tile

    # ---- conv1 over a (t1, wo+2) output window (row AND column halo) --------
    if stride == 1:
        cin = x_ref.shape[-1]
        # One dynamic row-window read of the padded image, then static slices.
        win = x_ref[0, pl.ds(r0, t1 + 2), :, :]          # (t1+2, wo+4, cin)

        def tap1(kh, kw):
            return lax.slice(win, (kh, kw, 0), (kh + t1, kw + wo + 2, cin))
    else:
        k9 = t_ref.shape[-1]
        cin = k9 // 9
        win = t_ref[0, pl.ds(r0, t1), :, :]              # (t1, wo+2, 9*cin)

        def tap1(kh, kw):
            i = 3 * kh + kw
            return lax.slice(win, (0, 0, i * cin), (t1, wo + 2, (i + 1) * cin))

    if stride != 1 and not acc1:
        # Taps are already K-packed along lanes: one matmul, no concatenate.
        h1 = jnp.dot(win.reshape(t1 * (wo + 2), k9), w1_ref[...],
                     preferred_element_type=jnp.float32)
    else:
        h1 = _conv3x3(tap1, w1_ref, t1, wo + 2, cin, acc1)
    h1 = jnp.maximum(h1 * s1_ref[...] + b1_ref[...], 0.0)
    h1 = h1.reshape(t1, wo + 2, cout)

    # Zero halo rows/cols falling outside the image (== conv2's zero padding).
    # Tiny iotas instead of a full (t1, wo, cout) int32 iota (review item).
    row = r0 - 1 + lax.broadcasted_iota(jnp.int32, (t1, 1, 1), 0)
    col = lax.broadcasted_iota(jnp.int32, (1, wo + 2, 1), 1)
    valid = (row >= 0) & (row < ho) & (col >= 1) & (col <= wo)
    h1p = jnp.where(valid, h1, 0.0).astype(jnp.bfloat16)  # (t1, wo+2, cout)
    # NOTE: conv2 input is quantized to bf16 here (documented deviation from an
    # all-f32 reference; covered by the test tolerance).

    # ---- conv2 + bn2, entirely from the VMEM-resident padded intermediate ---
    def tap2(kh, kw):
        return lax.slice(h1p, (kh, kw, 0), (kh + trh, kw + wo, cout))

    y = _conv3x3(tap2, w2_ref, trh, wo, cout, acc2)
    y = y * s2_ref[...] + b2_ref[...]

    # ---- shortcut ----
    if stride == 1:
        res = lax.slice(win, (2, 2, 0), (2 + trh, 2 + wo, cin))
        res = res.reshape(trh * wo, cin)
        if proj:
            sc = jnp.dot(res, wsc_ref[...], preferred_element_type=jnp.float32)
            sc = sc * ssc_ref[...] + bsc_ref[...]
        else:
            sc = res.astype(jnp.float32)
    else:
        # Centre tap (kh=1, kw=1) of the K-packed block IS x[h*s, w*s]; no
        # separate strided-shortcut input needed (review item).
        res = lax.slice(win, (1, 1, 4 * cin), (1 + trh, 1 + wo, 5 * cin))
        res = res.reshape(trh * wo, cin)
        sc = jnp.dot(res, wsc_ref[...], preferred_element_type=jnp.float32)
        sc = sc * ssc_ref[...] + bsc_ref[...]

    out = jnp.maximum(y + sc, 0.0).reshape(trh, wo, cout)
    o_ref[0] = out.astype(o_ref.dtype)


# ----------------------------- JAX-side helpers ----------------------------- #

def _fold_bn(g, b, m, v):
    scale = g / jnp.sqrt(v + _EPS)
    bias = b - m * scale
    return (scale.reshape(1, -1).astype(jnp.float32),
            bias.reshape(1, -1).astype(jnp.float32))


def _pick_row_tile(ho, wo, target_rows):
    """Largest divisor d of ho such that d*wo <= target_rows (>=1)."""
    if target_rows is None:
        return ho
    best = 1
    for d in range(1, ho + 1):
        if ho % d == 0 and d * wo <= target_rows:
            best = d
    return best


def _vmem_limit_bytes():
    # Review item: raise the scoped-VMEM limit above the ~32 MiB default so
    # larger row tiles fit, but keep headroom per generation (v7x = 64 MiB).
    try:
        cap = pltpu.get_tpu_info().vmem_capacity_bytes
        return int(min(cap * 3 // 4, 100 * 1024 * 1024))
    except Exception:
        return None


def basic_block_forward_nhwc(x, p, stride, *, row_tile_rows=2048,
                             out_dtype=jnp.bfloat16):
    """NHWC BasicBlock forward.  Chain blocks through this entry point so the
    NCHW<->NHWC transposes / pads stay at the network boundary."""
    N, H, W, cin = x.shape
    planes = p["w1"].shape[0]
    s = stride

    Ho = (H + 2 - 3) // s + 1
    Wo = (W + 2 - 3) // s + 1
    # Output rows per tile.  NOTE: roughly halve row_tile_rows on v7x (64 MiB
    # VMEM) vs v5e/v6e (128 MiB).
    trh = _pick_row_tile(Ho, Wo, row_tile_rows)
    rt = Ho // trh

    xb = x.astype(jnp.bfloat16)
    s1, b1 = _fold_bn(p["g1"], p["b1"], p["m1"], p["v1"])
    s2, b2 = _fold_bn(p["g2"], p["b2"], p["m2"], p["v2"])
    # 3x3 weights with taps folded into the contraction dim: (9*Cin, Cout).
    w1p = jnp.transpose(p["w1"], (2, 3, 1, 0)).reshape(9 * cin, planes)
    w1p = w1p.astype(jnp.bfloat16)
    w2p = jnp.transpose(p["w2"], (2, 3, 1, 0)).reshape(9 * planes, planes)
    w2p = w2p.astype(jnp.bfloat16)

    use_proj = (s != 1) or (cin != planes)
    acc1 = cin >= 128      # per-tap accumulation for large channel counts
    acc2 = planes >= 128

    vec_spec = pl.BlockSpec((1, planes), lambda n, r: (0, 0))
    w1_spec = pl.BlockSpec((9 * cin, planes), lambda n, r: (0, 0))
    w2_spec = pl.BlockSpec((9 * planes, planes), lambda n, r: (0, 0))
    out_spec = pl.BlockSpec((1, trh, Wo, planes), lambda n, r: (n, r, 0, 0))
    out_shape = jax.ShapeDtypeStruct((N, Ho, Wo, planes), out_dtype)

    cp_kwargs = dict(dimension_semantics=("parallel", "parallel"))
    lim = _vmem_limit_bytes()
    if lim is not None:
        cp_kwargs["vmem_limit_bytes"] = lim
    cparams = pltpu.CompilerParams(**cp_kwargs)

    if s == 1:
        # Pad rows/cols by 2 (1 conv pad + 1 extra halo for conv2's padding).
        xpad = jnp.pad(xb, ((0, 0), (2, 2), (2, 2), (0, 0)))
        inputs = [xpad, w1p, s1, b1, w2p, s2, b2]
        in_specs = [pl.BlockSpec((1, H + 4, W + 4, cin),
                                 lambda n, r: (n, 0, 0, 0)),
                    w1_spec, vec_spec, vec_spec,
                    w2_spec, vec_spec, vec_spec]
        if use_proj:
            ssc, bsc = _fold_bn(p["gs"], p["bs"], p["ms"], p["vs"])
            wsc = jnp.transpose(p["ws"][:, :, 0, 0], (1, 0)).astype(jnp.bfloat16)
            inputs += [wsc, ssc, bsc]
            in_specs += [pl.BlockSpec((cin, planes), lambda n, r: (0, 0)),
                         vec_spec, vec_spec]
    else:
        # Strided conv1: pre-pack K-folded taps at conv1-output resolution,
        # then add a zero row/col halo (halo positions are re-masked in-kernel
        # because bn1 would otherwise turn them into relu(bias) != 0).
        xpad1 = jnp.pad(xb, ((0, 0), (1, 1), (1, 1), (0, 0)))
        taps = []
        for kh in range(3):
            for kw in range(3):
                taps.append(lax.slice(
                    xpad1, (0, kh, kw, 0),
                    (N, kh + (Ho - 1) * s + 1, kw + (Wo - 1) * s + 1, cin),
                    (1, s, s, 1)))
        tk = jnp.concatenate(taps, axis=-1)                 # (N, Ho, Wo, 9*cin)
        tk = jnp.pad(tk, ((0, 0), (1, 1), (1, 1), (0, 0)))  # zero halo
        ssc, bsc = _fold_bn(p["gs"], p["bs"], p["ms"], p["vs"])
        wsc = jnp.transpose(p["ws"][:, :, 0, 0], (1, 0)).astype(jnp.bfloat16)
        inputs = [tk, w1p, s1, b1, w2p, s2, b2, wsc, ssc, bsc]
        in_specs = [pl.BlockSpec((1, Ho + 2, Wo + 2, 9 * cin),
                                 lambda n, r: (n, 0, 0, 0)),
                    w1_spec, vec_spec, vec_spec,
                    w2_spec, vec_spec, vec_spec,
                    pl.BlockSpec((cin, planes), lambda n, r: (0, 0)),
                    vec_spec, vec_spec]

    kernel = functools.partial(_basic_block_kernel, s, use_proj, acc1, acc2, Ho)
    return pl.pallas_call(
        kernel,
        out_shape=out_shape,
        grid=(N, rt),
        in_specs=in_specs,
        out_specs=out_spec,
        compiler_params=cparams,
    )(*inputs)


def basic_block_forward(x_nchw, p, stride, *, row_tile_rows=2048):
    # TODO(synk): in a full ResNet keep activations NHWC across blocks and do
    # these transposes only at the network boundary (review item).
    x = jnp.transpose(x_nchw, (0, 2, 3, 1))
    out = basic_block_forward_nhwc(x, p, stride, row_tile_rows=row_tile_rows)
    return jnp.transpose(out, (0, 3, 1, 2))                 # NCHW, bf16


# ------------------------------ reference impl ------------------------------ #

def reference_block(x_nchw, p, stride):
    """f32 reference, with inputs/weights quantized to the kernel's bf16."""
    x = jnp.transpose(x_nchw, (0, 2, 3, 1)).astype(jnp.float32)

    def q(a):
        return a.astype(jnp.bfloat16).astype(jnp.float32)

    def conv(inp, w_oihw, s, pad):
        return lax.conv_general_dilated(
            inp, jnp.transpose(q(w_oihw), (2, 3, 1, 0)), (s, s),
            ((pad, pad), (pad, pad)),
            dimension_numbers=("NHWC", "HWIO", "NHWC"),
            precision=lax.Precision.HIGHEST)

    def bn(y, g, b, m, v):
        return (y - m) / jnp.sqrt(v + _EPS) * g + b

    xq = q(x)
    planes, in_planes = p["w1"].shape[0], p["w1"].shape[1]
    out = jax.nn.relu(bn(conv(xq, p["w1"], stride, 1),
                         p["g1"], p["b1"], p["m1"], p["v1"]))
    out = bn(conv(out, p["w2"], 1, 1), p["g2"], p["b2"], p["m2"], p["v2"])
    if stride != 1 or in_planes != planes:
        sc = bn(conv(xq, p["ws"], stride, 0),
                p["gs"], p["bs"], p["ms"], p["vs"])
    else:
        sc = xq
    out = jax.nn.relu(out + sc)
    return jnp.transpose(out, (0, 3, 1, 2))


# -------------------------------- params init ------------------------------- #

def init_params(key, in_planes, planes, stride):
    ks = jax.random.split(key, 8)

    def bn_init(k):
        k1, k2, k3, k4 = jax.random.split(k, 4)
        return (1.0 + 0.1 * jax.random.normal(k1, (planes,), jnp.float32),
                0.1 * jax.random.normal(k2, (planes,), jnp.float32),
                0.1 * jax.random.normal(k3, (planes,), jnp.float32),
                0.9 + 0.2 * jax.random.uniform(k4, (planes,), jnp.float32))

    std1 = (2.0 / (9 * in_planes)) ** 0.5
    std2 = (2.0 / (9 * planes)) ** 0.5
    p = {
        "w1": std1 * jax.random.normal(ks[0], (planes, in_planes, 3, 3),
                                       jnp.float32),
        "w2": std2 * jax.random.normal(ks[1], (planes, planes, 3, 3),
                                       jnp.float32),
    }
    p["g1"], p["b1"], p["m1"], p["v1"] = bn_init(ks[2])
    p["g2"], p["b2"], p["m2"], p["v2"] = bn_init(ks[3])
    if stride != 1 or in_planes != planes:
        stds = (2.0 / in_planes) ** 0.5
        p["ws"] = stds * jax.random.normal(ks[4], (planes, in_planes, 1, 1),
                                           jnp.float32)
        p["gs"], p["bs"], p["ms"], p["vs"] = bn_init(ks[5])
    return p


# ----------------------------------- main ----------------------------------- #

if __name__ == "__main__":
    key = jax.random.PRNGKey(0)
    N = 2
    configs = [
        dict(in_planes=4, planes=8, stride=2, H=16, W=16, both=True),    # strided proj
        dict(in_planes=8, planes=8, stride=1, H=16, W=16, both=True),    # identity
        dict(in_planes=4, planes=8, stride=1, H=16, W=16, both=True),    # s=1 proj
        # large-channel configs exercise the per-tap accumulation path
        dict(in_planes=128, planes=128, stride=1, H=8, W=8, both=False),
        dict(in_planes=64, planes=128, stride=2, H=8, W=8, both=False),
    ]
    for i, cfg in enumerate(configs):
        kp, kx = jax.random.split(jax.random.fold_in(key, i))
        params = init_params(kp, cfg["in_planes"], cfg["planes"], cfg["stride"])
        x = jax.random.normal(kx, (N, cfg["in_planes"], cfg["H"], cfg["W"]),
                              jnp.float32)
        ref = jax.block_until_ready(reference_block(x, params, cfg["stride"]))

        Ho = (cfg["H"] - 1) // cfg["stride"] + 1
        Wo = (cfg["W"] - 1) // cfg["stride"] + 1
        # multi row-tile exercises the halo path; single tile exercises r=0=last
        targets = [max(Wo, (Ho // 2) * Wo)]
        if cfg["both"]:
            targets.append(2048)
        for tgt in targets:
            fwd = jax.jit(functools.partial(
                basic_block_forward, stride=cfg["stride"], row_tile_rows=tgt))
            out = jax.block_until_ready(fwd(x, params))
            assert out.shape == ref.shape, (out.shape, ref.shape)
            out32 = out.astype(jnp.float32)
            err = float(jnp.max(jnp.abs(out32 - ref)))
            assert bool(jnp.allclose(out32, ref, atol=6e-2, rtol=6e-2)), \
                (i, tgt, err)
    print("KERNEL_OK")
</pallas_src>

<mosaic_0001>
module attributes {stable_mosaic.version = 11 : i64} {
  func.func @_basic_block_kernel(%arg0: i32, %arg1: i32, %arg2: memref<1x10x10x36xbf16, #tpu.memory_space<vmem>>, %arg3: memref<36x8xbf16, #tpu.memory_space<vmem>>, %arg4: memref<1x8xf32, #tpu.memory_space<vmem>>, %arg5: memref<1x8xf32, #tpu.memory_space<vmem>>, %arg6: memref<72x8xbf16, #tpu.memory_space<vmem>>, %arg7: memref<1x8xf32, #tpu.memory_space<vmem>>, %arg8: memref<1x8xf32, #tpu.memory_space<vmem>>, %arg9: memref<4x8xbf16, #tpu.memory_space<vmem>>, %arg10: memref<1x8xf32, #tpu.memory_space<vmem>>, %arg11: memref<1x8xf32, #tpu.memory_space<vmem>>, %arg12: memref<1x4x8x8xbf16, #tpu.memory_space<vmem>>) attributes {dimension_semantics = [#tpu.dimension_semantics<parallel>, #tpu.dimension_semantics<parallel>], iteration_bounds = array<i64: 2, 2>, scalar_prefetch = 0 : i64, scratch_operands = 0 : i64, tpu.core_type = #tpu.core_type<tc>, window_params = [{transform_indices = @transform_0, window_bounds = array<i64: 1, 10, 10, 36>}, {pipeline_mode = #tpu.pipeline_mode<synchronous>, transform_indices = @transform_1, window_bounds = array<i64: 36, 8>}, {pipeline_mode = #tpu.pipeline_mode<synchronous>, transform_indices = @transform_2, window_bounds = array<i64: 1, 8>}, {pipeline_mode = #tpu.pipeline_mode<synchronous>, transform_indices = @transform_3, window_bounds = array<i64: 1, 8>}, {pipeline_mode = #tpu.pipeline_mode<synchronous>, transform_indices = @transform_4, window_bounds = array<i64: 72, 8>}, {pipeline_mode = #tpu.pipeline_mode<synchronous>, transform_indices = @transform_5, window_bounds = array<i64: 1, 8>}, {pipeline_mode = #tpu.pipeline_mode<synchronous>, transform_indices = @transform_6, window_bounds = array<i64: 1, 8>}, {pipeline_mode = #tpu.pipeline_mode<synchronous>, transform_indices = @transform_7, window_bounds = array<i64: 4, 8>}, {pipeline_mode = #tpu.pipeline_mode<synchronous>, transform_indices = @transform_8, window_bounds = array<i64: 1, 8>}, {pipeline_mode = #tpu.pipeline_mode<synchronous>, transform_indices = @transform_9, window_bounds = array<i64: 1, 8>}, {transform_indices = @transform_10, window_bounds = array<i64: 1, 4, 8, 8>}]} {
    %c4_i32 = arith.constant 4 : i32
    %0 = arith.muli %arg1, %c4_i32 : i32
    %c0 = arith.constant 0 : index
    %1 = arith.index_cast %0 : i32 to index
    %c0_0 = arith.constant 0 : index
    %c0_1 = arith.constant 0 : index
    %2 = vector.load %arg2[%c0, %1, %c0_0, %c0_1] : memref<1x10x10x36xbf16, #tpu.memory_space<vmem>>, vector<1x6x10x36xbf16>
    %3 = vector.shape_cast %2 : vector<1x6x10x36xbf16> to vector<6x10x36xbf16>
    %4 = vector.shape_cast %3 : vector<6x10x36xbf16> to vector<60x36xbf16>
    %c0_2 = arith.constant 0 : index
    %c0_3 = arith.constant 0 : index
    %5 = vector.load %arg3[%c0_2, %c0_3] : memref<36x8xbf16, #tpu.memory_space<vmem>>, vector<36x8xbf16>
    %cst = arith.constant dense<0.000000e+00> : vector<60x8xf32>
    %6 = tpu.matmul %4, %5, %cst {dimension_numbers = #tpu.dot_dimension_numbers<[1], [0], [0], [1], [0, 0, 1, 1], [], []>} : vector<60x36xbf16>, vector<36x8xbf16>, vector<60x8xf32> -> vector<60x8xf32>
    %c0_4 = arith.constant 0 : index
    %c0_5 = arith.constant 0 : index
    %7 = vector.load %arg4[%c0_4, %c0_5] : memref<1x8xf32, #tpu.memory_space<vmem>>, vector<1x8xf32>
    %8 = vector.broadcast %7 : vector<1x8xf32> to vector<60x8xf32>
    %9 = arith.mulf %6, %8 : vector<60x8xf32>
    %c0_6 = arith.constant 0 : index
    %c0_7 = arith.constant 0 : index
    %10 = vector.load %arg5[%c0_6, %c0_7] : memref<1x8xf32, #tpu.memory_space<vmem>>, vector<1x8xf32>
    %11 = vector.broadcast %10 : vector<1x8xf32> to vector<60x8xf32>
    %12 = arith.addf %9, %11 : vector<60x8xf32>
    %cst_8 = arith.constant 0.000000e+00 : f32
    %13 = vector.broadcast %cst_8 : f32 to vector<60x8xf32>
    %14 = arith.maximumf %12, %13 : vector<60x8xf32>
    %15 = vector.shape_cast %14 : vector<60x8xf32> to vector<6x10x8xf32>
    %c1_i32 = arith.constant 1 : i32
    %16 = arith.subi %0, %c1_i32 : i32
    %17 = tpu.iota {dimensions = array<i32: 0>} : vector<6x1x1xi32>
    %18 = vector.broadcast %16 : i32 to vector<6x1x1xi32>
    %19 = arith.addi %18, %17 : vector<6x1x1xi32>
    %20 = tpu.iota {dimensions = array<i32: 1>} : vector<1x10x1xi32>
    %c0_i32 = arith.constant 0 : i32
    %21 = vector.broadcast %c0_i32 : i32 to vector<6x1x1xi32>
    %22 = arith.cmpi sge, %19, %21 : vector<6x1x1xi32>
    %c8_i32 = arith.constant 8 : i32
    %23 = vector.broadcast %c8_i32 : i32 to vector<6x1x1xi32>
    %24 = arith.cmpi slt, %19, %23 : vector<6x1x1xi32>
    %25 = arith.andi %22, %24 : vector<6x1x1xi1>
    %c1_i32_9 = arith.constant 1 : i32
    %26 = vector.broadcast %c1_i32_9 : i32 to vector<1x10x1xi32>
    %27 = arith.cmpi sge, %20, %26 : vector<1x10x1xi32>
    %28 = vector.broadcast %25 : vector<6x1x1xi1> to vector<6x10x1xi1>
    %29 = vector.broadcast %27 : vector<1x10x1xi1> to vector<6x10x1xi1>
    %30 = arith.andi %28, %29 : vector<6x10x1xi1>
    %c8_i32_10 = arith.constant 8 : i32
    %31 = vector.broadcast %c8_i32_10 : i32 to vector<1x10x1xi32>
    %32 = arith.cmpi sle, %20, %31 : vector<1x10x1xi32>
    %33 = vector.broadcast %32 : vector<1x10x1xi1> to vector<6x10x1xi1>
    %34 = arith.andi %30, %33 : vector<6x10x1xi1>
    %cst_11 = arith.constant 0.000000e+00 : f32
    %35 = vector.shape_cast %34 : vector<6x10x1xi1> to vector<6x10x1xi1>
    %36 = vector.broadcast %35 : vector<6x10x1xi1> to vector<6x10x8xi1>
    %37 = vector.broadcast %cst_11 : f32 to vector<6x10x8xf32>
    %38 = arith.select %36, %15, %37 : vector<6x10x8xi1>, vector<6x10x8xf32>
    %39 = arith.truncf %38 : vector<6x10x8xf32> to vector<6x10x8xbf16>
    %40 = vector.extract_strided_slice %39 {offsets = [0, 0, 0], sizes = [4, 8, 8], strides = [1, 1, 1]} : vector<6x10x8xbf16> to vector<4x8x8xbf16>
    %41 = vector.extract_strided_slice %39 {offsets = [0, 1, 0], sizes = [4, 8, 8], strides = [1, 1, 1]} : vector<6x10x8xbf16> to vector<4x8x8xbf16>
    %42 = vector.extract_strided_slice %39 {offsets = [0, 2, 0], sizes = [4, 8, 8], strides = [1, 1, 1]} : vector<6x10x8xbf16> to vector<4x8x8xbf16>
    %43 = vector.extract_strided_slice %39 {offsets = [1, 0, 0], sizes = [4, 8, 8], strides = [1, 1, 1]} : vector<6x10x8xbf16> to vector<4x8x8xbf16>
    %44 = vector.extract_strided_slice %39 {offsets = [1, 1, 0], sizes = [4, 8, 8], strides = [1, 1, 1]} : vector<6x10x8xbf16> to vector<4x8x8xbf16>
    %45 = vector.extract_strided_slice %39 {offsets = [1, 2, 0], sizes = [4, 8, 8], strides = [1, 1, 1]} : vector<6x10x8xbf16> to vector<4x8x8xbf16>
    %46 = vector.extract_strided_slice %39 {offsets = [2, 0, 0], sizes = [4, 8, 8], strides = [1, 1, 1]} : vector<6x10x8xbf16> to vector<4x8x8xbf16>
    %47 = vector.extract_strided_slice %39 {offsets = [2, 1, 0], sizes = [4, 8, 8], strides = [1, 1, 1]} : vector<6x10x8xbf16> to vector<4x8x8xbf16>
    %48 = vector.extract_strided_slice %39 {offsets = [2, 2, 0], sizes = [4, 8, 8], strides = [1, 1, 1]} : vector<6x10x8xbf16> to vector<4x8x8xbf16>
    %49 = tpu.concatenate %40, %41, %42, %43, %44, %45, %46, %47, %48 in 2 : vector<4x8x8xbf16>, vector<4x8x8xbf16>, vector<4x8x8xbf16>, vector<4x8x8xbf16>, vector<4x8x8xbf16>, vector<4x8x8xbf16>, vector<4x8x8xbf16>, vector<4x8x8xbf16>, vector<4x8x8xbf16> -> vector<4x8x72xbf16>
    %50 = vector.shape_cast %49 : vector<4x8x72xbf16> to vector<32x72xbf16>
    %c0_12 = arith.constant 0 : index
    %c0_13 = arith.constant 0 : index
    %51 = vector.load %arg6[%c0_12, %c0_13] : memref<72x8xbf16, #tpu.memory_space<vmem>>, vector<72x8xbf16>
    %cst_14 = arith.constant dense<0.000000e+00> : vector<32x8xf32>
    %52 = tpu.matmul %50, %51, %cst_14 {dimension_numbers = #tpu.dot_dimension_numbers<[1], [0], [0], [1], [0, 0, 1, 1], [], []>} : vector<32x72xbf16>, vector<72x8xbf16>, vector<32x8xf32> -> vector<32x8xf32>
    %c0_15 = arith.constant 0 : index
    %c0_16 = arith.constant 0 : index
    %53 = vector.load %arg7[%c0_15, %c0_16] : memref<1x8xf32, #tpu.memory_space<vmem>>, vector<1x8xf32>
    %54 = vector.broadcast %53 : vector<1x8xf32> to vector<32x8xf32>
    %55 = arith.mulf %52, %54 : vector<32x8xf32>
    %c0_17 = arith.constant 0 : index
    %c0_18 = arith.constant 0 : index
    %56 = vector.load %arg8[%c0_17, %c0_18] : memref<1x8xf32, #tpu.memory_space<vmem>>, vector<1x8xf32>
    %57 = vector.broadcast %56 : vector<1x8xf32> to vector<32x8xf32>
    %58 = arith.addf %55, %57 : vector<32x8xf32>
    %59 = vector.extract_strided_slice %3 {offsets = [1, 1, 16], sizes = [4, 8, 4], strides = [1, 1, 1]} : vector<6x10x36xbf16> to vector<4x8x4xbf16>
    %60 = vector.shape_cast %59 : vector<4x8x4xbf16> to vector<32x4xbf16>
    %c0_19 = arith.constant 0 : index
    %c0_20 = arith.constant 0 : index
    %61 = vector.load %arg9[%c0_19, %c0_20] : memref<4x8xbf16, #tpu.memory_space<vmem>>, vector<4x8xbf16>
    %cst_21 = arith.constant dense<0.000000e+00> : vector<32x8xf32>
    %62 = tpu.matmul %60, %61, %cst_21 {dimension_numbers = #tpu.dot_dimension_numbers<[1], [0], [0], [1], [0, 0, 1, 1], [], []>} : vector<32x4xbf16>, vector<4x8xbf16>, vector<32x8xf32> -> vector<32x8xf32>
    %c0_22 = arith.constant 0 : index
    %c0_23 = arith.constant 0 : index
    %63 = vector.load %arg10[%c0_22, %c0_23] : memref<1x8xf32, #tpu.memory_space<vmem>>, vector<1x8xf32>
    %64 = vector.broadcast %63 : vector<1x8xf32> to vector<32x8xf32>
    %65 = arith.mulf %62, %64 : vector<32x8xf32>
    %c0_24 = arith.constant 0 : index
    %c0_25 = arith.constant 0 : index
    %66 = vector.load %arg11[%c0_24, %c0_25] : memref<1x8xf32, #tpu.memory_space<vmem>>, vector<1x8xf32>
    %67 = vector.broadcast %66 : vector<1x8xf32> to vector<32x8xf32>
    %68 = arith.addf %65, %67 : vector<32x8xf32>
    %69 = arith.addf %58, %68 : vector<32x8xf32>
    %cst_26 = arith.constant 0.000000e+00 : f32
    %70 = vector.broadcast %cst_26 : f32 to vector<32x8xf32>
    %71 = arith.maximumf %69, %70 : vector<32x8xf32>
    %72 = vector.shape_cast %71 : vector<32x8xf32> to vector<4x8x8xf32>
    %73 = arith.truncf %72 : vector<4x8x8xf32> to vector<4x8x8xbf16>
    %c0_27 = arith.constant 0 : index
    %c0_28 = arith.constant 0 : index
    %c0_29 = arith.constant 0 : index
    %c0_30 = arith.constant 0 : index
    %74 = vector.load %arg12[%c0_27, %c0_28, %c0_29, %c0_30] : memref<1x4x8x8xbf16, #tpu.memory_space<vmem>>, vector<1x4x8x8xbf16>
    %75 = vector.shape_cast %74 : vector<1x4x8x8xbf16> to vector<4x8x8xbf16>
    %76 = vector.shape_cast %73 : vector<4x8x8xbf16> to vector<1x4x8x8xbf16>
    tpu.vector_store %arg12[%c0_27, %c0_28, %c0_29, %c0_30], %76 {strides = array<i32>} : memref<1x4x8x8xbf16, #tpu.memory_space<vmem>>, vector<1x4x8x8xbf16>,
    return
  }
  func.func @transform_0(%arg0: i32, %arg1: i32) -> (i32, i32, i32, i32) {
    %c0_i32 = arith.constant 0 : i32
    %c0_i32_0 = arith.constant 0 : i32
    %c0_i32_1 = arith.constant 0 : i32
    %c0_i32_2 = arith.constant 0 : i32
    return %arg0, %c0_i32, %c0_i32_0, %c0_i32_1 : i32, i32, i32, i32
  }
  func.func @transform_1(%arg0: i32, %arg1: i32) -> (i32, i32) {
    %c0_i32 = arith.constant 0 : i32
    %c0_i32_0 = arith.constant 0 : i32
    %c0_i32_1 = arith.constant 0 : i32
    return %c0_i32, %c0_i32_0 : i32, i32
  }
  func.func @transform_2(%arg0: i32, %arg1: i32) -> (i32, i32) {
    %c0_i32 = arith.constant 0 : i32
    %c0_i32_0 = arith.constant 0 : i32
    %c0_i32_1 = arith.constant 0 : i32
    return %c0_i32, %c0_i32_0 : i32, i32
  }
  func.func @transform_3(%arg0: i32, %arg1: i32) -> (i32, i32) {
    %c0_i32 = arith.constant 0 : i32
    %c0_i32_0 = arith.constant 0 : i32
    %c0_i32_1 = arith.constant 0 : i32
    return %c0_i32, %c0_i32_0 : i32, i32
  }
  func.func @transform_4(%arg0: i32, %arg1: i32) -> (i32, i32) {
    %c0_i32 = arith.constant 0 : i32
    %c0_i32_0 = arith.constant 0 : i32
    %c0_i32_1 = arith.constant 0 : i32
    return %c0_i32, %c0_i32_0 : i32, i32
  }
  func.func @transform_5(%arg0: i32, %arg1: i32) -> (i32, i32) {
    %c0_i32 = arith.constant 0 : i32
    %c0_i32_0 = arith.constant 0 : i32
    %c0_i32_1 = arith.constant 0 : i32
    return %c0_i32, %c0_i32_0 : i32, i32
  }
  func.func @transform_6(%arg0: i32, %arg1: i32) -> (i32, i32) {
    %c0_i32 = arith.constant 0 : i32
    %c0_i32_0 = arith.constant 0 : i32
    %c0_i32_1 = arith.constant 0 : i32
    return %c0_i32, %c0_i32_0 : i32, i32
  }
  func.func @transform_7(%arg0: i32, %arg1: i32) -> (i32, i32) {
    %c0_i32 = arith.constant 0 : i32
    %c0_i32_0 = arith.constant 0 : i32
    %c0_i32_1 = arith.constant 0 : i32
    return %c0_i32, %c0_i32_0 : i32, i32
  }
  func.func @transform_8(%arg0: i32, %arg1: i32) -> (i32, i32) {
    %c0_i32 = arith.constant 0 : i32
    %c0_i32_0 = arith.constant 0 : i32
    %c0_i32_1 = arith.constant 0 : i32
    return %c0_i32, %c0_i32_0 : i32, i32
  }
  func.func @transform_9(%arg0: i32, %arg1: i32) -> (i32, i32) {
    %c0_i32 = arith.constant 0 : i32
    %c0_i32_0 = arith.constant 0 : i32
    %c0_i32_1 = arith.constant 0 : i32
    return %c0_i32, %c0_i32_0 : i32, i32
  }
  func.func @transform_10(%arg0: i32, %arg1: i32) -> (i32, i32, i32, i32) {
    %c0_i32 = arith.constant 0 : i32
    %c0_i32_0 = arith.constant 0 : i32
    %c0_i32_1 = arith.constant 0 : i32
    return %arg0, %arg1, %c0_i32, %c0_i32_0 : i32, i32, i32, i32
  }
}

</mosaic_0001>

<bundles_post_ra>
// kernel: basic_block_forward.1
= control target key start
LH: loop header
LB: loop body
LE: loop exit
PB: predicated region body
PF: predicated region fallthrough
CT: control target
= control target key end

     0   :  { %s2218_s13 = smov 0   ;;  %s2220_s14 = smov 0   ;;  %s2746_s0 = inlined_call_operand.vmem [shape: bf16[2,10,10,36], index: 0, kind: input, shape index: {}]   ;;  %s2747_s1 = inlined_call_operand.vmem [shape: bf16[36,8], index: 1, kind: input, shape index: {}]   ;;  %s2748_s2 = inlined_call_operand.vmem [shape: f32[1,8], index: 2, kind: input, shape index: {}]   ;;  %s2749_s3 = inlined_call_operand.vmem [shape: f32[1,8], index: 3, kind: input, shape index: {}]   ;;  %s2750_s4 = inlined_call_operand.vmem [shape: bf16[72,8], index: 4, kind: input, shape index: {}]   ;;  %s2751_s5 = inlined_call_operand.vmem [shape: f32[1,8], index: 5, kind: input, shape index: {}]   ;;  %s2752_s6 = inlined_call_operand.vmem [shape: f32[1,8], index: 6, kind: input, shape index: {}]   ;;  %s2753_s7 = inlined_call_operand.vmem [shape: bf16[4,8], index: 7, kind: input, shape index: {}]   ;;  %s2754_s8 = inlined_call_operand.vmem [shape: f32[1,8], index: 8, kind: input, shape index: {}]   ;;  %s2755_s9 = inlined_call_operand.vmem [shape: f32[1,8], index: 9, kind: input, shape index: {}]   ;;  %s2756_s10 = inlined_call_operand.vmem [shape: bf16[2,8,8,8], index: 10, kind: output, shape index: {}]  }
   0x1   :  { %s2222_s15 = smov 0   ;;  %s2224_s16 = smov 0  }
   0x2   :  { %s2226_s17 = smov 0  }
   0x3 LB: > { %s29_s18 = sadd.s32 1, %s2142_s15  ;;  %s32_s19 = sadd.s32 1, %s2146_s16  ;;  %s2150_s17 = sphi %s2226_s17, %s20_s17   ;;  %s2146_s16 = sphi %s2224_s16, %s2786_s16   ;;  %s2142_s15 = sphi %s2222_s15, %s2785_s15   ;;  %s2138_s14 = sphi %s2220_s14, %s2784_s14   ;;  %s2134_s13 = sphi %s2218_s13, %s2783_s13  }
   0x4   : > { %p30_p0 = scmp.ge.s32.totalorder %s29_s18, 2  ;;  %p1952_p1 = scmp.ge.s32.totalorder %s2150_s17, 1 }
   0x5   : > { %p326_p2 = scmp.lt.s32.totalorder %s2150_s17, 5 }
   0x6   : > { %s2788_s18 = smov (%p30_p0, %s29_s18), 0  ;;  %s2790_s19 = smov (!%p30_p0, %s32_s19), %s2146_s16 }
   0x7   : > { %p327_p3 = pnand %p1952_p1, %p326_p2  ;;  %p34_p4 = scmp.ge.s32.totalorder %s2790_s19, 2 }
   0x8   : > { %p368_p5 = scmp.lt.s32.totalorder (!%p327_p3), %s2138_s14, 1  ;;  %s1997_s27 = sshll.u32 (!%p327_p3), %s2134_s13, 5 }
   0x9   : > { %s2792_s19 = smov (%p34_p4, %s2790_s19), 0  ;;  %330 = sbr.rel (%p327_p3) target bundleno = 647 (0x287), region = 60 }
   0xa   : > { %s2365_s12 = sshll.u32 (!%p327_p3), %s2134_s13, 2  ;;  %s2154_s13 = smov (!%p327_p3), 48  }
   0xb   : > { %s1976_s24 = sadd.s32 (!%p327_p3), 4294967295, %s2365_s12  ;;  %s2155_s25 = smov (!%p327_p3), 24  }
   0xc   : > { %s2158_s28 = smov (!%p327_p3), 8   ;;  %s2159_s29 = smov (!%p327_p3), 64  }
   0xd   : > { %p376_p6 = scmp.lt.s32.totalorder (!%p327_p3), %s2365_s12, 7 }
   0xe   : > { %v2104_v0 = vld [vmem:[%s2747_s1 + $0x10] ss:$0 sps:$4 sm:$0x33]   ;;  %vm860_vm0 = vcmask 1041408   ;;  %v423_v1 = vlaneseq  ;;  %v2105_v2 = vld [vmem:[%s2747_s1 + $0x8] sm:$0xff]   ;;  %s2794_s14 = smov (!%p368_p5, %s2138_s14), 1 }
   0xf   : > { %2049 = vmatprep.subr.msk.bf16.mxu0 %vm860_vm0, %v2104_v0  ;;  %v862_v3 = vsel %vm860_vm0, %v2104_v0, 0  ;;  %v2106_v4 = vld [vmem:[%s2747_s1] sm:$0xff]   ;;  %v2152_v5 = vmov 1966171168   ;;  %s2052_s26 = smul.u32 80, %s2794_s14  ;;  %vm847_vm1 = vcmask 293888  }
  0x10   : > { %2016 = vmatpush3.bf16.msra.mxu0 %v862_v3  ;;  %v421_v6 = vunpack.c.l.s4 %v2152_v5  ;;  %v2263_v7 = vshrl.u32 %v423_v1, 7  ;;  %s2796_s12 = smov (!%p376_p6, %s2365_s12), 7  ;;  %s1955_s20 = sshll.u32 %s2794_s14, 3 }
  0x11   : > { %2017 = vmatprep.subr.bf16.mxu0 %v2105_v2  ;;  %s372_s30 = scalar_lea.vmem %s2746_s0, %s2052_s26  ;;  %s2156_s26 = smov 40  }
  0x12   : > { %v422_v8 = vunpack.c.0.s8 %v421_v6  ;;  %s2270_s11 = scalar_lea.vmem %s372_s30, %s1997_s27  ;;  %vm1130_vm6 = vcmp.ge.s32.totalorder %v2263_v7, 1  ;;  %s2157_s27 = smov 16  }
  0x13   : > { %v1960_v10 = vld.sshfl [vmem:[%s2270_s11] sm:$0x33 pattern:$0x75316420]  ;;  %v2277_v11 = vld [vmem:[%s2270_s11 + $0x8] sm:$0xf] }
  0x14   : > { %2018 = vmatpush3.bf16.msra.mxu0 %v2105_v2  ;;  %v2273_v9 = vsub.s32 %v422_v8, %v2263_v7  ;;  %v1961_v12 = vld.sshfl [vmem:[%s2270_s11 + $0x4] sm:$0x1 pattern:$0x75316420]  ;;  %v419_v13 = vcombine.high %v1960_v10, %v1960_v10  ;;  %v2284_v16 = vld [vmem:[%s2270_s11 + $0xc] sm:$0x1] }
  0x15   : > { %2019 = vmatprep.subr.bf16.mxu0 %v2106_v4  ;;  %v2288_v18 = vld [vmem:[%s2270_s11 + $0x10] sm:$0xf]  ;;  %v2291_v19 = vld [vmem:[%s2270_s11 + $0x14] sm:$0x1]  ;;  %v2294_v20 = vld [vmem:[%s2270_s11 + $0x18] sm:$0xf] }
  0x16   : > { %v426_v14 = vrot.slane %v1960_v10, %v2273_v9  ;;  %v456_v15 = vrot.slane %v2277_v11, %v2273_v9  ;;  %v449_v17 = vrot.slane %v1961_v12, %v2273_v9  ;;  %v480_v21 = vrot.slane %v2284_v16, %v2273_v9  ;;  %v2303_v26 = vld [vmem:[%s2270_s11 + $0x1c] sm:$0x1]  ;;  %v2323_v54 = vld [vmem:[%s2270_s11 + $0x20] sm:$0xf]  ;;  %v2327_v56 = vld [vmem:[%s2270_s11 + $0x24] sm:$0x1] }
  0x17   : > { %v433_v22 = vrot.slane %v419_v13, %v2273_v9  ;;  %v494_v25 = vrot.slane %v2288_v18, %v2273_v9  ;;  %v518_v28 = vrot.slane %v2291_v19, %v2273_v9  ;;  %v532_v29 = vrot.slane %v2294_v20, %v2273_v9  ;;  %v1962_v61 = vld.sshfl [vmem:[%s2270_s11 + $0x28] sm:$0x33 pattern:$0x75316420]  ;;  %s2160_s30 = smov 32  }
  0x18   : > { %2020 = vmatpush3.bf16.msra.mxu0 %v2106_v4  ;;  %v457_v23 = vcombine.high %v456_v15, %v456_v15  ;;  %v464_v24 = vrot.slane %v456_v15, %v2273_v9  ;;  %v487_v27 = vrot.slane %v480_v21, %v2273_v9  ;;  %v556_v30 = vrot.slane %v2303_v26, %v2273_v9  ;;  %v1963_v12 = vld.sshfl [vmem:[%s2270_s11 + $0x2c] sm:$0x1 pattern:$0x75316420]  ;;  %s2161_s11 = smov 56  }
  0x19   : > { %v645_v33 = vcombine.low %v426_v14, %v433_v22  ;;  %v1964_v34 = vcombine.high %v426_v14, %v433_v22  ;;  %v495_v36 = vcombine.high %v494_v25, %v494_v25  ;;  %v502_v37 = vrot.slane %v494_v25, %v2273_v9 }
  0x1a   : > { %v471_v31 = vrot.slane %v457_v23, %v2273_v9  ;;  %v472_v32 = vcombine.high %v464_v24, %v464_v24  ;;  %v647_v35 = vcombine.low %v449_v17, %v464_v24  ;;  %v525_v38 = vrot.slane %v518_v28, %v2273_v9 }
  0x1b   : > { %v655_v41 = vrot.slane %v645_v33, %v2273_v9  ;;  %v662_v42 = vrot.slane %v1964_v34, %v2273_v9  ;;  %v509_v44 = vrot.slane %v495_v36, %v2273_v9  ;;  %v540_v45 = vrot.slane %v532_v29, %v2273_v9 }
  0x1c   : > { %v473_v39 = vcombine.high %v471_v31, %v471_v31  ;;  %v648_v40 = vcombine.low %v471_v31, %v472_v32  ;;  %v669_v43 = vrot.slane %v647_v35, %v2273_v9  ;;  %v533_v46 = vcombine.high %v532_v29, %v532_v29 }
  0x1d   : > { %v677_v48 = vcombine.low %v655_v41, %v662_v42  ;;  %v563_v50 = vrot.slane %v556_v30, %v2273_v9  ;;  %v695_v51 = vcombine.low %v502_v37, %v509_v44  ;;  %v1965_v52 = vcombine.high %v502_v37, %v509_v44 }
  0x1e   : > { %v676_v47 = vrot.slane %v648_v40, %v2273_v9  ;;  %v694_v49 = vcombine.low %v473_v39, %v487_v27  ;;  %v697_v53 = vcombine.low %v525_v38, %v540_v45  ;;  %v547_v55 = vrot.slane %v533_v46, %v2273_v9 }
  0x1f   : > { %v685_v58 = vrot.slane %v677_v48, %v2273_v9  ;;  %v548_v60 = vcombine.high %v540_v45, %v540_v45  ;;  %v711_v62 = vrot.slane %v695_v51, %v2273_v9  ;;  %v718_v63 = vrot.slane %v1965_v52, %v2273_v9 }
  0x20   : > { %v678_v57 = vcombine.low %v669_v43, %v676_v47  ;;  %v704_v59 = vrot.slane %v694_v49, %v2273_v9  ;;  %v725_v0 = vrot.slane %v697_v53, %v2273_v9  ;;  %v549_v1 = vcombine.high %v547_v55, %v547_v55  ;;  %v2370_v53 = vld [vmem:[%s2748_s2] ss:$0 sm:$0xff] }
  0x21   : > { %v570_v3 = vrot.slane %v2323_v54, %v2273_v9  ;;  %v743_v4 = vcombine.low %v547_v55, %v548_v60  ;;  %v594_v5 = vrot.slane %v2327_v56, %v2273_v9  ;;  %v609_v13 = vcombine.high %v1962_v61, %v1962_v61 }
  0x22   : > { %v692_v2 = vrot.slane %v678_v57, %v2273_v9  ;;  %v726_v6 = vcombine.low %v704_v59, %v711_v62  ;;  %v727_v8 = vcombine.low %v718_v63, %v725_v0  ;;  %v744_v10 = vcombine.low %v549_v1, %v563_v50 }
  0x23   : > { %v571_v15 = vcombine.high %v570_v3, %v570_v3  ;;  %v578_v17 = vrot.slane %v570_v3, %v2273_v9  ;;  %v753_v21 = vrot.slane %v743_v4, %v2273_v9  ;;  %v601_v25 = vrot.slane %v594_v5, %v2273_v9 }
  0x24   : > { %v693_v14 = vcombine.low %v685_v58, %v692_v2  ;;  %v734_v22 = vrot.slane %v726_v6, %v2273_v9  ;;  %v741_v23 = vrot.slane %v727_v8, %v2273_v9  ;;  %v760_v24 = vrot.slane %v744_v10, %v2273_v9 }
  0x25   : > { %v585_v27 = vrot.slane %v571_v15, %v2273_v9  ;;  %v616_v28 = vrot.slane %v1962_v61, %v2273_v9  ;;  %v623_v29 = vrot.slane %v609_v13, %v2273_v9  ;;  %v639_v30 = vrot.slane %v1963_v12, %v2273_v9 }
  0x26   : > { %2021 = vmatprep.mubr.msk.bf16.mxu0 %vm847_vm1, %v693_v14  ;;  %v742_v31 = vcombine.low %v734_v22, %v741_v23  ;;  %v775_v32 = vcombine.low %v753_v21, %v760_v24  ;;  %v2153_v55 = vmov 1983009808   ;;  %v2381_v0 = vstv %s1976_s24 }
  0x27   : > { %v745_v33 = vcombine.low %v578_v17, %v585_v27  ;;  %v1966_v34 = vcombine.high %v578_v17, %v585_v27  ;;  %v624_v35 = vcombine.high %v616_v28, %v616_v28  ;;  %v625_v36 = vcombine.high %v623_v29, %v623_v29 }
  0x28   : > { %2022 = vmatmul.mubr.msk.bf16.vlgmr.msra.gmra.mxu0 %vm847_vm1, %v742_v31  ;;  %v792_v37 = vcombine.low %v601_v25, %v616_v28  ;;  %v783_v44 = vrot.slane %v775_v32, %v2273_v9  ;;  %v977_v57 = vunpack.c.l.s4 %v2153_v55  ;;  %v1105_v5 = vadd.s32 2, %v2381_v0 }
  0x29   : > { %v767_v38 = vrot.slane %v745_v33, %v2273_v9  ;;  %v774_v39 = vrot.slane %v1966_v34, %v2273_v9  ;;  %v793_v40 = vcombine.low %v623_v29, %v624_v35  ;;  %v794_v41 = vcombine.low %v625_v36, %v639_v30 }
  0x2a   : > { %v801_v42 = vrot.slane %v792_v37, %v2273_v9  ;;  %v978_v62 = vunpack.c.0.s8 %v977_v57  ;;  %v2391_v14 = vadd.s32 8, %v2263_v7  ;;  %vm1114_vm2 = vcmp.ge.s32.totalorder %v1105_v5, 0 }
  0x2b   : > { %v776_v43 = vcombine.low %v767_v38, %v774_v39  ;;  %v808_v45 = vrot.slane %v793_v40, %v2273_v9  ;;  %v815_v46 = vrot.slane %v794_v41, %v2273_v9  ;;  %vm1120_vm3 = vcmp.lt.s32.totalorder %v1105_v5, 8 }
  0x2c   : > { %v2387_v8 = vsub.s32 %v978_v62, %v2263_v7  ;;  %vm1112_vm4 = vcmp.ge.s32.totalorder %v2381_v0, 0  ;;  %vm1118_vm5 = vcmp.lt.s32.totalorder %v2381_v0, 8  ;;  %vm2405_vm7 = vmand %vm1114_vm2, %vm1120_vm3  ;;  %vm1161_vm9 = vcmp.le.s32.totalorder %v2391_v14, 8  ;;  %v1753_v14 = vld [vmem:[%s2753_s7] sm:$0x3] }
  0x2d   : > { %v790_v47 = vrot.slane %v776_v43, %v2273_v9  ;;  %v816_v48 = vcombine.low %v801_v42, %v808_v45  ;;  %v830_v49 = vrot.slane %v815_v46, %v2273_v9  ;;  %vm2417_vm8 = vmand %vm1112_vm4, %vm1118_vm5  ;;  %2051 = vmatprep.subr.msk.bf16.mxu0 %vm860_vm0, %v1753_v14 }
  0x2e   : > { %vm2429_vm10 = vmand %vm2405_vm7, %vm1161_vm9 }
  0x2f   : > { %v791_v50 = vcombine.low %v783_v44, %v790_v47  ;;  %v823_v51 = vrot.slane %v816_v48, %v2273_v9  ;;  %v2375_v9 = vld [vmem:[%s2749_s3] ss:$0 sm:$0xff]  ;;  %vm2441_vm11 = vmand %vm2417_vm8, %vm1161_vm9 }
  0x30   : > { %vm2453_vm12 = vmand %vm2417_vm8, %vm1130_vm6 }
  0x31   : > { %2025 = vmatprep.mubr.msk.bf16.mxu0 %vm847_vm1, %v791_v50  ;;  %v831_v52 = vcombine.low %v823_v51, %v830_v49  ;;  %vm1152_vm13 = vmand %vm2405_vm7, %vm1130_vm6 }
  0x33   : > { %2026 = vmatmul.mubr.msk.bf16.gmra.mxu0 %vm847_vm1, %v831_v52 }
  0xe8   : > { %v2023_v58 = vpop.f32.mrf.mxu0 }
  0xe9   : > { %v938_v59 = vmul.f32 %v2023_v58, %v2370_v53 }
  0xea   : > { %v898_v60 = vpop.f32.mrf.mxu0 }
  0xeb   : > { %v953_v61 = vadd.f32 %v2375_v9, %v938_v59  ;;  %v936_v63 = vmul.f32 %v2370_v53, %v898_v60 }
  0xec   : > { %v2024_v1 = vpop.f32.mrf.mxu0 }
  0xed   : > { %v961_v2 = vmax.f32 %v953_v61, 0.0  ;;  %v951_v3 = vadd.f32 %v2375_v9, %v936_v63  ;;  %v939_v4 = vmul.f32 %v2024_v1, %v2370_v53 }
  0xee   : > { %v901_v6 = vpop.f32.mrf.mxu0 }
  0xef   : > { %v1009_v10 = vcombine.high %v961_v2, %v961_v2  ;;  %v959_v12 = vmax.f32 %v951_v3, 0.0  ;;  %v954_v13 = vadd.f32 %v2375_v9, %v939_v4  ;;  %v937_v15 = vmul.f32 %v2370_v53, %v901_v6 }
  0xf0   : > { %v1016_v44 = vrot.slane %v961_v2, %v2387_v8  ;;  %v1104_v2 = vadd.s32 1, %v2381_v0 }
  0xf1   : > { %v1023_v17 = vrot.slane %v1009_v10, %v2387_v8  ;;  %v975_v21 = vcombine.high %v959_v12, %v959_v12  ;;  %v982_v22 = vrot.slane %v959_v12, %v2387_v8  ;;  %v962_v23 = vmax.f32 %v954_v13, 0.0 }
  0xf2   : > { %v952_v24 = vadd.f32 %v2375_v9, %v937_v15  ;;  %vm1113_vm14 = vcmp.ge.s32.totalorder %v1104_v2, 0  ;;  %vm1119_vm15 = vcmp.lt.s32.totalorder %v1104_v2, 8 }
  0xf3   : > { %v1025_v25 = vcombine.high %v1023_v17, %v1023_v17  ;;  %v989_v27 = vrot.slane %v975_v21, %v2387_v8  ;;  %v990_v28 = vcombine.high %v982_v22, %v982_v22  ;;  %v2027_v29 = vpop.f32.mrf.mxu0  ;;  %v1026_v30 = vcombine.high %v962_v23, %v962_v23  ;;  %vm2489_vm1 = vmand %vm1113_vm14, %vm1119_vm15 }
  0xf4   : > { %v1033_v31 = vrot.slane %v962_v23, %v2387_v8  ;;  %v960_v32 = vmax.f32 %v952_v24, 0.0  ;;  %v942_v33 = vmul.f32 %v2027_v29, %v2370_v53  ;;  %vm2500_vm2 = vmand %vm2489_vm1, %vm1130_vm6 }
  0xf5   : > { %v1250_v34 = vcombine.low %v1023_v17, %v1025_v25  ;;  %v991_v35 = vcombine.high %v989_v27, %v989_v27  ;;  %v1202_v36 = vcombine.low %v982_v22, %v990_v28  ;;  %v2410_v38 = vrot.slane %v1026_v30, %v2387_v8  ;;  %v914_v43 = vpop.f32.mrf.mxu0  ;;  %vm2515_vm3 = vmand %vm2489_vm1, %vm1161_vm9 }
  0xf6   : > { %v1041_v39 = vcombine.high %v1033_v31, %v1033_v31  ;;  %v992_v40 = vcombine.high %v960_v32, %v960_v32  ;;  %v999_v41 = vrot.slane %v960_v32, %v2387_v8  ;;  %v957_v46 = vadd.f32 %v2375_v9, %v942_v33 }
  0xf7   : > { %v1203_v45 = vcombine.low %v989_v27, %v991_v35  ;;  %v1210_v47 = vrot.slane %v1202_v36, %v2387_v8  ;;  %v1273_v55 = vrot.slane %v2410_v38, %v2387_v8  ;;  %v940_v59 = vmul.f32 %v2370_v53, %v914_v43  ;;  %v2028_v4 = vpop.f32.mrf.mxu0 }
  0xf8   : > { %v1251_v49 = vcombine.low %v1033_v31, %v1041_v39  ;;  %v1006_v50 = vrot.slane %v992_v40, %v2387_v8  ;;  %v1007_v51 = vcombine.high %v999_v41, %v999_v41  ;;  %v1225_v58 = vrot.slane %v999_v41, %v2387_v8 }
  0xf9   : > { %v1217_v52 = vrot.slane %v1203_v45, %v2387_v8  ;;  %v1258_v60 = vrot.slane %v1250_v34, %v2387_v8  ;;  %v965_v1 = vmax.f32 %v957_v46, 0.0  ;;  %v955_v12 = vadd.f32 %v2375_v9, %v940_v59  ;;  %v917_v28 = vpop.f32.mrf.mxu0 }
  0xfa   : > { %v1265_v61 = vrot.slane %v1251_v49, %v2387_v8  ;;  %v1008_v62 = vcombine.high %v1006_v50, %v1006_v50  ;;  %v1226_v6 = vcombine.low %v1007_v51, %v1006_v50  ;;  %v1363_v13 = vsel %vm2429_vm10, %v1273_v55, 0.0 }
  0xfb   : > { %v1218_v3 = vcombine.low %v1210_v47, %v1217_v52  ;;  %v1359_v17 = vsel %vm2441_vm11, %v1225_v58, 0.0  ;;  %v1077_v23 = vcombine.high %v965_v1, %v965_v1  ;;  %v963_v24 = vmax.f32 %v955_v12, 0.0 }
  0xfc   : > { %v1266_v5 = vcombine.low %v1258_v60, %v1265_v61  ;;  %v1227_v10 = vcombine.low %v1008_v62, %v1016_v44  ;;  %v1234_v29 = vrot.slane %v1226_v6, %v2387_v8  ;;  %v943_v32 = vmul.f32 %v2028_v4, %v2370_v53 }
  0xfd   : > { %v1358_v15 = vsel %vm2453_vm12, %v1218_v3, 0.0  ;;  %v1043_v30 = vcombine.high %v963_v24, %v963_v24  ;;  %v1050_v31 = vrot.slane %v963_v24, %v2387_v8  ;;  %v1024_v33 = vcombine.high %v1016_v44, %v1016_v44 }
  0xfe   : > { %v1362_v21 = vsel %vm1152_vm13, %v1266_v5, 0.0  ;;  %v1241_v22 = vrot.slane %v1227_v10, %v2387_v8  ;;  %v2472_v27 = vpack.c.bf16 %v1359_v17, %v1358_v15  ;;  %v2478_v34 = vrot.slane %v965_v1, %v2387_v8  ;;  %v2109_v17 = vld [vmem:[%s2750_s4 + $0x10] sm:$0xff]  }
  0xff   : > { %v2470_v25 = vpack.c.bf16 %v1363_v13, %v1362_v21  ;;  %v1091_v36 = vrot.slane %v1077_v23, %v2387_v8  ;;  %v941_v37 = vmul.f32 %v2370_v53, %v917_v28  ;;  %v1057_v41 = vrot.slane %v1043_v30, %v2387_v8 }
 0x100   : > { %v1242_v35 = vcombine.low %v1234_v29, %v1241_v22  ;;  %v1058_v42 = vcombine.high %v1050_v31, %v1050_v31  ;;  %v958_v43 = vadd.f32 %v2375_v9, %v943_v32  ;;  %v1416_v44 = vrot.slane %v2472_v27, 1 }
 0x101   : > { %1462 = vrot.lane.b32.xlu0 %v2470_v25, %s2154_s13  ;;  %1431 = vrot.lane.b32.xlu1 %v2470_v25, %s2155_s25  ;;  %v1418_v39 = vrot.slane %v2470_v25, 1  ;;  %v1106_v45 = vadd.s32 3, %v2381_v0  ;;  %v1249_v46 = vrot.slane %v1024_v33, %v2387_v8  ;;  %v1092_v47 = vcombine.high %v2478_v34, %v2478_v34 }
 0x102   : > { %v966_v48 = vmax.f32 %v958_v43, 0.0  ;;  %v1393_v49 = vshll.u32 %v2470_v25, 16  ;;  %v1042_v51 = vcombine.high %v2410_v38, %v2410_v38  ;;  %v1093_v52 = vcombine.high %v1091_v36, %v1091_v36 }
 0x103   : > { %v956_v55 = vadd.f32 %v2375_v9, %v941_v37  ;;  %v1360_v57 = vsel %vm2500_vm2, %v1242_v35, 0.0  ;;  %v1275_v58 = vcombine.low %v1058_v42, %v1057_v41  ;;  %vm1115_vm4 = vcmp.ge.s32.totalorder %v1106_v45, 0 }
 0x104   : > { %v1100_v59 = vrot.slane %v966_v48, %v2387_v8  ;;  %v1395_v60 = vrot.slane %v1393_v49, 1  ;;  %vm1121_vm5 = vcmp.lt.s32.totalorder %v1106_v45, 8  ;;  %v1391_v61 = vshrl.u32 %v2470_v25, 16 }
 0x105   : > { %1455 = vrot.lane.b32.xlu1 %v1418_v39, %s2156_s26  ;;  %1420 = vrot.lane.b32.xlu0 %v1416_v44, %s2157_s27  ;;  %v1361_v62 = vsel %vm2515_vm3, %v1249_v46, 0.0  ;;  %v1322_v63 = vcombine.low %v1092_v47, %v1091_v36  ;;  %v1274_v1 = vcombine.low %v1042_v51, %v1050_v31  ;;  %v1108_v9 = vadd.s32 5, %v2381_v0  ;;  %vm2532_vm7 = vmand %vm1115_vm4, %vm1121_vm5 }
 0x106   : > { %v2530_v38 = vpack.c.bf16 %v1361_v62, %v1360_v57  ;;  %v1059_v2 = vcombine.high %v1057_v41, %v1057_v41  ;;  %v964_v3 = vmax.f32 %v956_v55, 0.0  ;;  %v1396_v4 = vor.u32 %v1395_v60, %v1391_v61  ;;  %vm2546_vm11 = vmand %vm2532_vm7, %vm1130_vm6  ;;  %v2107_v62 = vld [vmem:[%s2750_s4 + $0x20] ss:$0 sps:$4 sm:$0xff]  }
 0x107   : > { %v1289_v6 = vrot.slane %v1275_v58, %v2387_v8  ;;  %v1323_v10 = vcombine.low %v1093_v52, %v1100_v59  ;;  %v1379_v12 = vshll.u32 %v2472_v27, 16  ;;  %v1282_v13 = vrot.slane %v1274_v1, %v2387_v8  ;;  %vm2556_vm12 = vmand %vm2532_vm7, %vm1161_vm9  ;;  %v2108_v1 = vld [vmem:[%s2750_s4 + $0x18] sm:$0xff]  }
 0x108   : > { %vm1117_vm8 = vcmp.ge.s32.totalorder %v1108_v9, 0  ;;  %vm1123_vm10 = vcmp.lt.s32.totalorder %v1108_v9, 8  ;;  %v1330_v15 = vrot.slane %v1322_v63, %v2387_v8  ;;  %v1297_v21 = vrot.slane %v1059_v2, %v2387_v8 }
 0x109   : > { %1424 = vrot.lane.b32.xlu0 %v1418_v39, %s2157_s27  ;;  %1408 = vrot.lane.b32.xlu1 %v1396_v4, %s2158_s28  ;;  %v1060_v22 = vcombine.high %v964_v3, %v964_v3  ;;  %v1417_v23 = vrot.slane %v2530_v38, 1  ;;  %v1290_v28 = vcombine.low %v1282_v13, %v1289_v6  ;;  %v1101_v29 = vcombine.high %v1100_v59, %v1100_v59  ;;  %vm1129_vm13 = vmand %vm1117_vm8, %vm1123_vm10 }
 0x10a   : > { %v1337_v30 = vrot.slane %v1323_v10, %v2387_v8  ;;  %v1381_v31 = vrot.slane %v1379_v12, 1  ;;  %v1377_v32 = vshrl.u32 %v2472_v27, 16  ;;  %v1365_v33 = vsel %vm2556_vm12, %v1297_v21, 0.0  ;;  %vm1158_vm14 = vmand %vm1129_vm13, %vm1130_vm6 }
 0x10b   : > { %v1067_v35 = vrot.slane %v964_v3, %v2387_v8  ;;  %v1074_v36 = vrot.slane %v1060_v22, %v2387_v8  ;;  %v1364_v37 = vsel %vm2546_vm11, %v1290_v28, 0.0  ;;  %vm1177_vm15 = vmand %vm1129_vm13, %vm1161_vm9  ;;  %v1107_v46 = vadd.s32 4, %v2381_v0 }
 0x10c   : > { %v1382_v40 = vor.u32 %v1381_v31, %v1377_v32  ;;  %v1338_v41 = vcombine.low %v1330_v15, %v1337_v30  ;;  %v2578_v42 = vpack.c.bf16 %v1365_v33, %v1364_v37  ;;  %v1386_v55 = vshll.u32 %v2530_v38, 16 }
 0x10d   : > { %1486 = vrot.lane.b32.xlu0 %v1418_v39, %s2159_s29  ;;  %1422 = vrot.lane.b32.xlu1 %v1417_v23, %s2157_s27  ;;  %v1345_v39 = vrot.slane %v1101_v29, %v2387_v8  ;;  %v1075_v43 = vcombine.high %v1067_v35, %v1067_v35  ;;  %v1076_v44 = vcombine.high %v1074_v36, %v1074_v36  ;;  %vm1116_vm1 = vcmp.ge.s32.totalorder %v1107_v46, 0 }
 0x10e   : > { %v1368_v53 = vsel %vm1158_vm14, %v1338_v41, 0.0  ;;  %vm1122_vm2 = vcmp.lt.s32.totalorder %v1107_v46, 8  ;;  %v1419_v50 = vrot.slane %v2578_v42, 1  ;;  %v1400_v51 = vshll.u32 %v2578_v42, 16 }
 0x10f   : > { %v1369_v45 = vsel %vm1177_vm15, %v1345_v39, 0.0  ;;  %v1298_v48 = vcombine.low %v1067_v35, %v1075_v43  ;;  %v1299_v49 = vcombine.low %v1074_v36, %v1076_v44  ;;  %vm1128_vm3 = vmand %vm1116_vm1, %vm1122_vm2  ;;  %v1321_v59 = vrot.slane %v2478_v34, %v2387_v8 }
 0x110   : > { %v2585_v47 = vpack.c.bf16 %v1369_v45, %v1368_v53  ;;  %v1402_v57 = vrot.slane %v1400_v51, 1  ;;  %vm2599_vm4 = vmand %vm1128_vm3, %vm1130_vm6  ;;  %v1388_v61 = vrot.slane %v1386_v55, 1  ;;  %vm1619_vm5 = vcmask 1043456   ;;  %v2111_v53 = vld [vmem:[%s2750_s4] sm:$0xff]  }
 0x111   : > { %1429 = vrot.lane.b32.xlu0 %v2530_v38, %s2155_s25  ;;  %1446 = vrot.lane.b32.xlu1 %v1396_v4, %s2160_s30  ;;  %v1306_v0 = vrot.slane %v1298_v48, %v2387_v8  ;;  %v1313_v52 = vrot.slane %v1299_v49, %v2387_v8  ;;  %vm1175_vm7 = vmand %vm1128_vm3, %vm1161_vm9  ;;  %v1398_v7 = vshrl.u32 %v2578_v42, 16  ;;  %v1384_v63 = vshrl.u32 %v2530_v38, 16 }
 0x112   : > { %2050 = vmatprep.subr.msk.bf16.mxu1 %vm1619_vm5, %v2107_v62  ;;  %v1621_v8 = vsel %vm1619_vm5, %v2107_v62, 0  ;;  %v1367_v9 = vsel %vm1175_vm7, %v1321_v59, 0.0  ;;  %v1698_v5 = vshrl.u32 %v2277_v11, 16  ;;  %v1701_v6 = vshll.u32 %v2277_v11, 16 }
 0x113   : > { %v1314_v60 = vcombine.low %v1306_v0, %v1313_v52  ;;  %v1403_v34 = vor.u32 %v1402_v57, %v1398_v7  ;;  %2030 = vmatpush3.bf16.msra.mxu1 %v1621_v8  ;;  %v1389_v2 = vor.u32 %v1388_v61, %v1384_v63  ;;  %v1473_v12 = vshll.u32 %v2585_v47, 16 }
 0x114   : > { %2031 = vmatprep.subr.bf16.mxu1 %v2108_v1  ;;  %v1712_v13 = vshrl.u32 %v2288_v18, 16  ;;  %v1715_v15 = vshll.u32 %v2288_v18, 16  ;;  %v1700_v21 = vrot.slane %v1698_v5, 4  ;;  %v1703_v11 = vrot.slane %v1701_v6, 5 }
 0x115   : > { %1404 = vrot.lane.b32.xlu0 %v1382_v40, %s2158_s28  ;;  %1464 = vrot.lane.b32.xlu1 %v2578_v42, %s2154_s13  ;;  %v1366_v3 = vsel %vm2599_vm4, %v1314_v60, 0.0  ;;  %v1726_v22 = vshrl.u32 %v2294_v20, 16  ;;  %v1740_v24 = vshrl.u32 %v2323_v54, 16  ;;  %v1743_v18 = vshll.u32 %v2323_v54, 16 }
 0x116   : > { %v1374_v10 = vpack.c.bf16 %v1367_v9, %v1366_v3  ;;  %v1471_v28 = vshrl.u32 %v2585_v47, 16  ;;  %v1475_v29 = vrot.slane %v1473_v12, 1  ;;  %v1714_v30 = vrot.slane %v1712_v13, 4 }
 0x117   : > { %2032 = vmatpush3.bf16.msra.mxu1 %v2108_v1  ;;  %v1717_v31 = vrot.slane %v1715_v15, 5  ;;  %v1704_v32 = vor.u32 %v1703_v11, %v1700_v21  ;;  %v1707_v33 = vshll.u32 %v2284_v16, 16  ;;  %v1721_v35 = vshll.u32 %v2291_v19, 16 }
 0x118   : > { %2033 = vmatprep.subr.bf16.mxu1 %v2109_v17  ;;  %v1728_v54 = vrot.slane %v1726_v22, 4  ;;  %v1742_v37 = vrot.slane %v1740_v24, 4  ;;  %v1745_v39 = vrot.slane %v1743_v18, 5  ;;  %v1476_v40 = vor.u32 %v1475_v29, %v1471_v28 }
 0x119   : > { %1433 = vrot.lane.b32.xlu0 %v2578_v42, %s2155_s25  ;;  %1468 = vrot.lane.b32.xlu1 %v2585_v47, %s2154_s13  ;;  %v1440_v41 = vshll.u32 %v1374_v10, 16  ;;  %v1718_v43 = vor.u32 %v1717_v31, %v1714_v30  ;;  %vm1695_vm6 = vsmask.f32 7440  ;;  %v1709_v16 = vrot.slane %v1707_v33, 5 }
 0x11a   : > { %v1723_v19 = vrot.slane %v1721_v35, 5  ;;  %v1735_v44 = vshll.u32 %v2303_v26, 16  ;;  %v1705_v45 = vrot.slane %v1704_v32, 4  ;;  %v1746_v48 = vor.u32 %v1745_v39, %v1742_v37 }
 0x11b   : > { %2034 = vmatpush3.bf16.msra.mxu1 %v2109_v17  ;;  %v1749_v49 = vshll.u32 %v2327_v56, 16  ;;  %v1438_v51 = vshrl.u32 %v1374_v10, 16  ;;  %v1442_v0 = vrot.slane %v1440_v41, 1  ;;  %v1719_v52 = vrot.slane %v1718_v43, 4 }
 0x11c   : > { %v1737_v57 = vrot.slane %v1735_v44, 5  ;;  %v1747_v58 = vrot.slane %v1746_v48, 4  ;;  %v1485_v8 = vrot.slane %v2585_v47, 1  ;;  %vm1494_vm8 = vcmask 64512  }
 0x11d   : > { %1453 = vrot.lane.b32.xlu0 %v1417_v23, %s2156_s26  ;;  %1426 = vrot.lane.b32.xlu1 %v1419_v50, %s2157_s27  ;;  %v1729_v23 = vshll.u32 %v2294_v20, 16  ;;  %v2110_v20 = vld [vmem:[%s2750_s4 + $0x8] sm:$0xff]   ;;  %v1751_v56 = vrot.slane %v1749_v49, 5  ;;  %v1443_v59 = vor.u32 %v1442_v0, %v1438_v51  ;;  %vm1503_vm10 = vcmask 130048  }
 0x11e   : > { %2035 = vmatprep.subr.bf16.mxu1 %v2110_v20  ;;  %vm1512_vm11 = vcmask 195584   ;;  %vm1521_vm12 = vcmask 261120   ;;  %vm1530_vm13 = vcmask 326656   ;;  %vm1539_vm14 = vcmask 392192  }
 0x11f   : > { %v1731_v36 = vrot.slane %v1729_v23, 5  ;;  %2036 = vmatpush3.bf16.msra.mxu1 %v2110_v20  ;;  %vm1548_vm15 = vcmask 457728   ;;  %vm1557_vm1 = vcmask 523264   ;;  %vm1612_vm2 = vcmask 588800  }
 0x120   : > { %2037 = vmatprep.subr.bf16.mxu1 %v2111_v53  ;;  %vm1764_vm3 = vcmask 31744   ;;  %vm1857_vm4 = vcmask 60416  }
 0x121   : > { %1477 = vrot.lane.b32.xlu0 %v1396_v4, %s2161_s11  ;;  %1488 = vrot.lane.b32.xlu1 %v1419_v50, %s2159_s29  ;;  %v1772_v4 = vsel %vm860_vm0, %v1753_v14, 0  ;;  %vm1694_vm0 = vsmask.f32 3328  ;;  %v1732_v46 = vor.u32 %v1731_v36, %v1728_v54 }
 0x122   : > { %2044 = vmatpush3.bf16.msra.mxu0 %v1772_v4  ;;  %vm2657_vm9 = vmor %vm1694_vm0, %vm1695_vm6 }
 0x123   : > { %2038 = vmatpush3.bf16.msra.mxu1 %v2111_v53  ;;  %v1733_v55 = vrot.slane %v1732_v46, 4  ;;  %v1710_v60 = vsel %vm2657_vm9, %v1705_v45, %v1709_v16  ;;  %v1724_v61 = vsel %vm2657_vm9, %v1719_v52, %v1723_v19  ;;  %v1752_v63 = vsel %vm2657_vm9, %v1747_v58, %v1751_v56 }
 0x124   : > { %v1988_v62 = vcombine.low %v1710_v60, %v1724_v61 }
 0x125   : > { %1457 = vrot.lane.b32.xlu0 %v1419_v50, %s2156_s26  ;;  %1410 = vrot.lane.b32.xlu1 %v1403_v34, %s2158_s28  ;;  %v1452_v50 = vrot.slane %v1374_v10, 1  ;;  %v1738_v7 = vsel %vm2657_vm9, %v1733_v55, %v1737_v57 }
 0x129   : > { %1406 = vrot.lane.b32.xlu0 %v1389_v2, %s2158_s28  ;;  %1435 = vrot.lane.b32.xlu1 %v1374_v10, %s2155_s25  ;;  %s379_s28 = sadd.s32 %s1955_s20, %s2796_s12 }
 0x12a   : > { %s1956_s22 = sshll.u32 %s379_s28, 2 }
 0x12b   : > { %s381_s23 = scalar_lea.vmem %s2756_s10, %s1956_s22 }
 0x12d   : > { %1444 = vrot.lane.b32.xlu0 %v1389_v2, %s2160_s30  ;;  %1479 = vrot.lane.b32.xlu1 %v1403_v34, %s2161_s11 }
 0x131   : > { %1448 = vrot.lane.b32.xlu0 %v1403_v34, %s2160_s30  ;;  %1483 = vrot.lane.b32.xlu1 %v1476_v40, %s2161_s11  ;;  %v1989_v34 = vcombine.low %v1738_v7, %v1752_v63 }
 0x135   : > { %1466 = vrot.lane.b32.xlu0 %v1374_v10, %s2154_s13  ;;  %1459 = vrot.lane.b32.xlu1 %v1452_v50, %s2156_s26  ;;  %s2162_s13 = smov 112  }
 0x139   : > { %1490 = vrot.lane.b32.xlu0 %v1452_v50, %s2159_s29  ;;  %1450 = vrot.lane.b32.xlu1 %v1443_v59, %s2160_s30 }
 0x13d   : > { %1481 = vrot.lane.b32.xlu0 %v1443_v59, %s2161_s11  ;;  %1492 = vrot.lane.b32.xlu1 %v1485_v8, %s2159_s29 }
 0x141   : > { %1760 = vrot.lane.b32.xlu0 %v1988_v62, %s2162_s13  ;;  %1762 = vrot.lane.b32.xlu1 %v1989_v34, %s2162_s13 }
 0x173   : > { %v1463_v1 = vpop.permute.xlu0 %1462  ;;  %v1432_v14 = vpop.permute.xlu1 %1431 }
 0x177   : > { %v1421_v9 = vpop.permute.xlu0 %1420  ;;  %v1456_v2 = vpop.permute.xlu1 %1455 }
 0x17b   : > { %v1425_v3 = vpop.permute.xlu0 %1424  ;;  %v1409_v4 = vpop.permute.xlu1 %1408 }
 0x17c   : > { %v1500_v46 = vsel %vm1494_vm8, %v2470_v25, %v1409_v4  ;;  %v1992_v4 = vld [vmem:[%s2754_s8] ss:$0 sm:$0xff] }
 0x17d   : > { %v1509_v50 = vsel %vm1503_vm10, %v1500_v46, %v1425_v3  ;;  %v1986_v3 = vld [vmem:[%s2751_s5] ss:$0 sm:$0xff] }
 0x17f   : > { %v1487_v5 = vpop.permute.xlu0 %1486  ;;  %v1423_v6 = vpop.permute.xlu1 %1422 }
 0x183   : > { %v1430_v10 = vpop.permute.xlu0 %1429  ;;  %v1447_v12 = vpop.permute.xlu1 %1446 }
 0x187   : > { %v1405_v13 = vpop.permute.xlu0 %1404  ;;  %v1465_v15 = vpop.permute.xlu1 %1464 }
 0x188   : > { %v1496_v18 = vsel %vm1494_vm8, %v2472_v27, %v1405_v13  ;;  %v1993_v13 = vld [vmem:[%s2755_s9] ss:$0 sm:$0xff] }
 0x189   : > { %v1505_v30 = vsel %vm1503_vm10, %v1496_v18, %v1421_v9 }
 0x18a   : > { %v1514_v20 = vsel %vm1512_vm11, %v1505_v30, %v1430_v10 }
 0x18b   : > { %v1434_v17 = vpop.permute.xlu0 %1433  ;;  %v1469_v47 = vpop.permute.xlu1 %1468 }
 0x18c   : > { %v1518_v51 = vsel %vm1512_vm11, %v1509_v50, %v1434_v17 }
 0x18f   : > { %v1454_v21 = vpop.permute.xlu0 %1453  ;;  %v1427_v11 = vpop.permute.xlu1 %1426 }
 0x193   : > { %v1478_v22 = vpop.permute.xlu0 %1477  ;;  %v1489_v23 = vpop.permute.xlu1 %1488 }
 0x197   : > { %v1458_v24 = vpop.permute.xlu0 %1457  ;;  %v1411_v28 = vpop.permute.xlu1 %1410 }
 0x198   : > { %v1502_v0 = vsel %vm1494_vm8, %v2578_v42, %v1411_v28 }
 0x199   : > { %v1511_v57 = vsel %vm1503_vm10, %v1502_v0, %v1427_v11 }
 0x19b   : > { %v1407_v29 = vpop.permute.xlu0 %1406  ;;  %v1436_v35 = vpop.permute.xlu1 %1435 }
 0x19c   : > { %v1498_v31 = vsel %vm1494_vm8, %v2530_v38, %v1407_v29  ;;  %v1520_v58 = vsel %vm1512_vm11, %v1511_v57, %v1436_v35 }
 0x19d   : > { %v1507_v32 = vsel %vm1503_vm10, %v1498_v31, %v1423_v6  ;;  %v1987_v6 = vld [vmem:[%s2752_s6] ss:$0 sm:$0xff] }
 0x19e   : > { %v1516_v33 = vsel %vm1512_vm11, %v1507_v32, %v1432_v14 }
 0x19f   : > { %v1445_v27 = vpop.permute.xlu0 %1444  ;;  %v1525_v54 = vsel %vm1521_vm12, %v1516_v33, %v1447_v12  ;;  %v1480_v41 = vpop.permute.xlu1 %1479 }
 0x1a0   : > { %v1523_v36 = vsel %vm1521_vm12, %v1514_v20, %v1445_v27  ;;  %v1534_v37 = vsel %vm1530_vm13, %v1525_v54, %v1456_v2 }
 0x1a1   : > { %v1532_v38 = vsel %vm1530_vm13, %v1523_v36, %v1454_v21  ;;  %v1543_v39 = vsel %vm1539_vm14, %v1534_v37, %v1465_v15 }
 0x1a2   : > { %v1541_v40 = vsel %vm1539_vm14, %v1532_v38, %v1463_v1  ;;  %v1552_v43 = vsel %vm1548_vm15, %v1543_v39, %v1480_v41 }
 0x1a3   : > { %v1449_v16 = vpop.permute.xlu0 %1448  ;;  %v1550_v19 = vsel %vm1548_vm15, %v1541_v40, %v1478_v22  ;;  %v1561_v53 = vsel %vm1557_vm1, %v1552_v43, %v1489_v23  ;;  %v1484_v48 = vpop.permute.xlu1 %1483 }
 0x1a4   : > { %v1559_v44 = vsel %vm1557_vm1, %v1550_v19, %v1487_v5  ;;  %v1527_v26 = vsel %vm1521_vm12, %v1518_v51, %v1449_v16 }
 0x1a5   : > { %v1977_v45 = vcombine.low %v1559_v44, %v1561_v53  ;;  %v1536_v25 = vsel %vm1530_vm13, %v1527_v26, %v1458_v24 }
 0x1a7   : > { %v1467_v49 = vpop.permute.xlu0 %1466  ;;  %2039 = vmatprep.mubr.msk.bf16.mxu1 %vm1612_vm2, %v1977_v45  ;;  %v1460_v52 = vpop.permute.xlu1 %1459 }
 0x1a8   : > { %v1545_v59 = vsel %vm1539_vm14, %v1536_v25, %v1467_v49 }
 0x1ab   : > { %v1491_v55 = vpop.permute.xlu0 %1490  ;;  %v1451_v56 = vpop.permute.xlu1 %1450 }
 0x1ac   : > { %v1529_v60 = vsel %vm1521_vm12, %v1520_v58, %v1451_v56 }
 0x1ad   : > { %v1538_v62 = vsel %vm1530_vm13, %v1529_v60, %v1460_v52 }
 0x1ae   : > { %v1547_v7 = vsel %vm1539_vm14, %v1538_v62, %v1469_v47 }
 0x1af   : > { %v1482_v61 = vpop.permute.xlu0 %1481  ;;  %v1556_v8 = vsel %vm1548_vm15, %v1547_v7, %v1484_v48  ;;  %v1493_v34 = vpop.permute.xlu1 %1492 }
 0x1b0   : > { %v1554_v42 = vsel %vm1548_vm15, %v1545_v59, %v1482_v61  ;;  %v1565_v1 = vsel %vm1557_vm1, %v1556_v8, %v1493_v34 }
 0x1b1   : > { %v1563_v63 = vsel %vm1557_vm1, %v1554_v42, %v1491_v55 }
 0x1b2   : > { %v1978_v9 = vcombine.low %v1563_v63, %v1565_v1 }
 0x1b3   : > { %v1761_v14 = vpop.permute.xlu0 %1760  ;;  %v1763_v2 = vpop.permute.xlu1 %1762 }
 0x1b4   : > { %2045 = vmatprep.mubr.msk.bf16.mxu0 %vm1764_vm3, %v1761_v14  ;;  %2040 = vmatmul.mubr.msk.bf16.vlgmr.msra.gmra.mxu1 %vm1612_vm2, %v1978_v9 }
 0x1b5   : > { %2046 = vmatmul.mubr.msk.bf16.vlgmr.msra.gmra.mxu0 %vm1764_vm3, %v1763_v2 }
 0x274   : > { %v2041_v5 = vpop.f32.mrf.mxu1 }
 0x275   : > { %v1681_v10 = vmul.f32 %v2041_v5, %v1986_v3  ;;  %v2047_v12 = vpop.f32.mrf.mxu0 }
 0x276   : > { %v1832_v15 = vmul.f32 %v2047_v12, %v1992_v4  ;;  %v1657_v17 = vpop.f32.mrf.mxu1 }
 0x277   : > { %v1692_v47 = vadd.f32 %v1987_v6, %v1681_v10  ;;  %v1679_v21 = vmul.f32 %v1986_v3, %v1657_v17  ;;  %v1808_v11 = vpop.f32.mrf.mxu0 }
 0x278   : > { %v1843_v22 = vadd.f32 %v1993_v13, %v1832_v15  ;;  %v1830_v23 = vmul.f32 %v1992_v4, %v1808_v11  ;;  %v2042_v24 = vpop.f32.mrf.mxu1 }
 0x279   : > { %v1690_v18 = vadd.f32 %v1987_v6, %v1679_v21  ;;  %v1682_v28 = vmul.f32 %v2042_v24, %v1986_v3  ;;  %v2048_v29 = vpop.f32.mrf.mxu0 }
 0x27a   : > { %v1847_v30 = vadd.f32 %v1843_v22, %v1692_v47  ;;  %v1841_v31 = vadd.f32 %v1993_v13, %v1830_v23  ;;  %v1833_v32 = vmul.f32 %v2048_v29, %v1992_v4  ;;  %v1660_v33 = vpop.f32.mrf.mxu1 }
 0x27b   : > { %v1693_v35 = vadd.f32 %v1987_v6, %v1682_v28  ;;  %v1680_v20 = vmul.f32 %v1986_v3, %v1660_v33  ;;  %v1811_v27 = vpop.f32.mrf.mxu0 }
 0x27c   : > { %v1851_v54 = vmax.f32 %v1847_v30, 0.0  ;;  %v1845_v36 = vadd.f32 %v1841_v31, %v1690_v18  ;;  %v1844_v37 = vadd.f32 %v1993_v13, %v1833_v32  ;;  %v1831_v38 = vmul.f32 %v1992_v4, %v1811_v27 }
 0x27d   : > { %v1691_v39 = vadd.f32 %v1987_v6, %v1680_v20 }
 0x27e   : > { %v1855_v40 = vpack.c.bf16 %v1851_v54, %v1851_v54  ;;  %v1849_v41 = vmax.f32 %v1845_v36, 0.0  ;;  %v1848_v43 = vadd.f32 %v1844_v37, %v1693_v35  ;;  %v1842_v16 = vadd.f32 %v1993_v13, %v1831_v38 }
 0x280   : > { %1860 = vst.msk [vmem:[%s381_s23 + $0x8] sm:$0xf] %vm1857_vm4, %v1855_v40  ;;  %v1853_v19 = vpack.c.bf16 %v1849_v41, %v1849_v41  ;;  %v1852_v44 = vmax.f32 %v1848_v43, 0.0  ;;  %v1846_v53 = vadd.f32 %v1842_v16, %v1691_v39 }
 0x282   : > { %1858 = vst.msk [vmem:[%s381_s23] sm:$0xf] %vm1857_vm4, %v1853_v19  ;;  %v1856_v45 = vpack.c.bf16 %v1852_v44, %v1852_v44  ;;  %v1850_v46 = vmax.f32 %v1846_v53, 0.0 }
 0x284   : > { %1861 = vst.msk [vmem:[%s381_s23 + $0xc] sm:$0xf] %vm1857_vm4, %v1856_v45  ;;  %v1854_v48 = vpack.c.bf16 %v1850_v46, %v1850_v46 }
 0x286   : > { %1859 = vst.msk [vmem:[%s381_s23 + $0x4] sm:$0xf] %vm1857_vm4, %v1854_v48 }
 0x287 PF: > { %s20_s17 = sadd.s32 1, %s2150_s17   ;;  %s2783_s13 = smov %s2142_s15 }
 0x288   : > { %p17_p7 = scmp.ge.s32.totalorder %s20_s17, 6   ;;  %s2784_s14 = smov %s2146_s16 }
 0x289   : > { %s2785_s15 = smov %s2788_s18  ;;  %s2786_s16 = smov %s2792_s19 }
 0x28a   :  { %19 = sbr.rel (!%p17_p7) target bundleno = 3 (0x3), region = 91 }

</bundles_post_ra>
